<compile_context>
chip_gen: v5e
topology: v5e:2x2
jax: 0.10.0
libtpu: 0.0.40
codegen_flags: <defaults>
</compile_context>

<pallas_src>
from functools import partial

import jax
import jax.numpy as jnp
from jax import lax
from jax.experimental import pallas as pl
from jax.experimental.pallas import tpu as pltpu


def _round_up(x: int, m: int) -> int:
    return ((x + m - 1) // m) * m


def _cdiv(a: int, b: int) -> int:
    return -(-a // b)


# ----------------------------------------------------------------------------
# Fused Pallas kernel:  out = relu(col @ W1 + b1) @ W2 + b2   (per M-tile)
# ----------------------------------------------------------------------------
def _fused_embed_kernel(col_ref, w1_ref, b1_ref, w2_ref, b2_ref, o_ref):
    # Conv-as-matmul (bf16 in, f32 accumulate) + bias + ReLU.
    feat = jnp.dot(col_ref[...], w1_ref[...], preferred_element_type=jnp.float32)
    feat = jnp.maximum(feat + b1_ref[...], 0.0)            # (TILE_M, Fd_pad) f32
    # Projection (bf16 in, f32 accumulate) + bias.
    out = jnp.dot(feat.astype(w2_ref.dtype), w2_ref[...],
                  preferred_element_type=jnp.float32)
    o_ref[...] = (out + b2_ref[...]).astype(o_ref.dtype)    # (TILE_M, E_pad)


# ----------------------------------------------------------------------------
# Tile-size selection
# ----------------------------------------------------------------------------
def _vmem_tile_cap(K, Fd_pad, E_pad, out_bytes, budget=40 * 1024 * 1024):
    """Max TILE_M whose working set fits the VMEM budget (safe for v7x 64 MiB)."""
    resident = (K * Fd_pad + Fd_pad * E_pad) * 2 + (Fd_pad + E_pad) * 4
    per_row = (2 * K * 2            # double-buffered bf16 col tile
               + 2 * E_pad * out_bytes  # double-buffered output tile
               + Fd_pad * 4)        # f32 feat temp between the two matmuls
    return max(16, (budget - resident) // per_row)


def _choose_tile_m(M, cap):
    """Prefer an exact divisor of M (multiple of 16, >= 2 grid steps) so the
    col buffer never needs jnp.pad; otherwise round up to a 16-multiple."""
    cap = max(16, (cap // 16) * 16)
    if M >= 32:
        t = min(cap, (M // 2) // 16 * 16)
        while t >= 16:
            if M % t == 0:
                return t, M                       # exact: no M padding at all
            t -= 16
        # No nice divisor -> pad M (padded rows are sliced off afterwards).
        n_steps = max(2, _cdiv(M, cap))
        tile = _round_up(_cdiv(M, n_steps), 16)
        return tile, _round_up(M, tile)
    tile = _round_up(M, 16)
    return tile, tile


# ----------------------------------------------------------------------------
# pallas_call wrapper
# ----------------------------------------------------------------------------
def fused_conv_proj(col, w1, b1, w2, b2, *, out_dtype=jnp.float32):
    """col: (M, K) bf16; w1: (K, Fd_pad) bf16; b1: (1, Fd_pad) f32;
       w2: (Fd_pad, E_pad) bf16; b2: (1, E_pad) f32  ->  (M_pad, E_pad)."""
    M, K = col.shape
    Fd_pad = w1.shape[1]
    E_pad = w2.shape[1]
    out_bytes = jnp.dtype(out_dtype).itemsize

    cap = min(2048, _vmem_tile_cap(K, Fd_pad, E_pad, out_bytes))
    TILE_M, M_pad = _choose_tile_m(M, cap)
    if M_pad != M:
        col = jnp.pad(col, ((0, M_pad - M), (0, 0)))   # fallback only

    grid = (M_pad // TILE_M,)

    return pl.pallas_call(
        _fused_embed_kernel,
        out_shape=jax.ShapeDtypeStruct((M_pad, E_pad), out_dtype),
        grid_spec=pltpu.PrefetchScalarGridSpec(
            num_scalar_prefetch=0,
            grid=grid,
            in_specs=[
                pl.BlockSpec((TILE_M, K), lambda i: (i, 0)),       # streamed
                pl.BlockSpec((K, Fd_pad), lambda i: (0, 0)),       # resident
                pl.BlockSpec((1, Fd_pad), lambda i: (0, 0)),       # resident
                pl.BlockSpec((Fd_pad, E_pad), lambda i: (0, 0)),   # resident
                pl.BlockSpec((1, E_pad), lambda i: (0, 0)),        # resident
            ],
            out_specs=pl.BlockSpec((TILE_M, E_pad), lambda i: (i, 0)),
        ),
        compiler_params=pltpu.CompilerParams(
            dimension_semantics=("parallel",),
            vmem_limit_bytes=48 * 1024 * 1024,
            # Let XLA fuse the im2col tap-concat producer into the col operand.
            allow_input_fusion=[True, False, False, False, False],
        ),
    )(col, w1, b1, w2, b2)


# ----------------------------------------------------------------------------
# Glue: NHWC im2col for a 3x3 / stride-2 / pad-1 conv.  Early bf16 cast so the
# largest intermediate (the col buffer) is half-width; channel-last layout
# makes the final flatten(2).transpose(1,2) and the im2col reshape free.
# ----------------------------------------------------------------------------
def im2col_nhwc(x_nchw, kh, kw, stride, pad, dtype=jnp.bfloat16):
    x = jnp.transpose(x_nchw.astype(dtype), (0, 2, 3, 1))        # bf16, NCHW->NHWC
    B, H, W, C = x.shape
    xp = jnp.pad(x, ((0, 0), (pad, pad), (pad, pad), (0, 0)))
    Ho = (H + 2 * pad - kh) // stride + 1
    Wo = (W + 2 * pad - kw) // stride + 1
    taps = [xp[:, i:i + stride * Ho:stride, j:j + stride * Wo:stride, :]
            for i in range(kh) for j in range(kw)]
    col = jnp.concatenate(taps, axis=-1)                          # (B, Ho, Wo, kh*kw*C)
    return col.reshape(B * Ho * Wo, kh * kw * C), Ho, Wo


# ----------------------------------------------------------------------------
# Parameter prep (once, outside the hot path): transpose, 128-pad, bf16-cast.
# NOTE: keep 128-pad granularity here; bumping to 256 only pays off on
# v6e/v7x when the real Fd/E are already >= 256 (synthetic dims stay at 128).
# ----------------------------------------------------------------------------
def prepare_params(conv_w, conv_b, proj_w, proj_b):
    Fd, Cin, kh, kw = conv_w.shape                                # PyTorch OIHW
    E = proj_w.shape[0]                                           # PyTorch (out, in)
    Fd_pad = _round_up(Fd, 128)
    E_pad = _round_up(E, 128)

    # Conv weight -> (kh*kw*Cin, Fd), column order (i, j, c) matching im2col_nhwc.
    w1 = conv_w.transpose(2, 3, 1, 0).reshape(kh * kw * Cin, Fd)
    w1 = jnp.pad(w1, ((0, 0), (0, Fd_pad - Fd))).astype(jnp.bfloat16)
    b1 = jnp.pad(conv_b, (0, Fd_pad - Fd)).reshape(1, Fd_pad).astype(jnp.float32)

    # Linear weight -> (Fd_pad, E_pad); padded Fd rows / E cols are zero so the
    # padded lanes contribute nothing.
    w2 = jnp.pad(proj_w.T, ((0, Fd_pad - Fd), (0, E_pad - E))).astype(jnp.bfloat16)
    b2 = jnp.pad(proj_b, (0, E_pad - E)).reshape(1, E_pad).astype(jnp.float32)

    return {"w1": w1, "b1": b1, "w2": w2, "b2": b2,
            "kh": kh, "kw": kw, "embed_dim": E}


# ----------------------------------------------------------------------------
# HybridEmbed forward
# ----------------------------------------------------------------------------
def hybrid_embed_forward(x, prep, *, out_dtype=jnp.float32):
    """x: (B, C, H, W) NCHW -> (B, num_patches, embed_dim)."""
    B = x.shape[0]
    E = prep["embed_dim"]

    # backbone(x)[-1] (conv3x3 s2 p1 + ReLU) fused with flatten/transpose and
    # proj Linear inside one Pallas kernel.
    col, Ho, Wo = im2col_nhwc(x, prep["kh"], prep["kw"], stride=2, pad=1,
                              dtype=jnp.bfloat16)
    out = fused_conv_proj(col, prep["w1"], prep["b1"], prep["w2"], prep["b2"],
                          out_dtype=out_dtype)
    M = B * Ho * Wo
    if out.shape[0] != M:          # only in the no-nice-divisor fallback path
        out = out[:M]
    return out[:, :E].reshape(B, Ho * Wo, E)


# ----------------------------------------------------------------------------
# Pure-JAX f32 reference for verification
# ----------------------------------------------------------------------------
def reference_forward(x, params):
    y = lax.conv_general_dilated(
        x, params["conv_w"], window_strides=(2, 2), padding=((1, 1), (1, 1)),
        dimension_numbers=("NCHW", "OIHW", "NCHW"))
    y = y + params["conv_b"][None, :, None, None]
    y = jnp.maximum(y, 0.0)
    B, C, Ho, Wo = y.shape
    y = y.reshape(B, C, Ho * Wo).transpose(0, 2, 1)               # flatten(2).transpose(1,2)
    return y @ params["proj_w"].T + params["proj_b"]


if __name__ == "__main__":
    # Small shapes consistent with the module's forward.
    B, Cin, H, W = 2, 4, 16, 16
    feature_dim, embed_dim = 32, 48

    key = jax.random.PRNGKey(0)
    k_x, k_cw, k_cb, k_pw, k_pb = jax.random.split(key, 5)

    x = jax.random.normal(k_x, (B, Cin, H, W), dtype=jnp.float32)
    params = {
        "conv_w": 0.1 * jax.random.normal(k_cw, (feature_dim, Cin, 3, 3), jnp.float32),
        "conv_b": 0.1 * jax.random.normal(k_cb, (feature_dim,), jnp.float32),
        "proj_w": 0.1 * jax.random.normal(k_pw, (embed_dim, feature_dim), jnp.float32),
        "proj_b": 0.1 * jax.random.normal(k_pb, (embed_dim,), jnp.float32),
    }

    prep = prepare_params(params["conv_w"], params["conv_b"],
                          params["proj_w"], params["proj_b"])

    out = jax.block_until_ready(hybrid_embed_forward(x, prep))
    ref = jax.block_until_ready(reference_forward(x, params))

    assert out.shape == (B, (H // 2) * (W // 2), embed_dim), out.shape
    # bf16 MXU inputs (f32 accumulation) vs pure-f32 reference -> loose-ish tol.
    err = float(jnp.max(jnp.abs(out - ref)))
    assert jnp.allclose(out, ref, rtol=2e-2, atol=2e-2), err
    print("KERNEL_OK")
</pallas_src>

<mosaic_0001>
module attributes {stable_mosaic.version = 11 : i64} {
  func.func @_fused_embed_kernel(%arg0: i32, %arg1: memref<64x36xbf16, #tpu.memory_space<vmem>>, %arg2: memref<36x128xbf16, #tpu.memory_space<vmem>>, %arg3: memref<1x128xf32, #tpu.memory_space<vmem>>, %arg4: memref<128x128xbf16, #tpu.memory_space<vmem>>, %arg5: memref<1x128xf32, #tpu.memory_space<vmem>>, %arg6: memref<64x128xf32, #tpu.memory_space<vmem>>) attributes {dimension_semantics = [#tpu.dimension_semantics<parallel>], iteration_bounds = array<i64: 2>, scalar_prefetch = 0 : i64, scratch_operands = 0 : i64, tpu.core_type = #tpu.core_type<tc>, window_params = [{transform_indices = @transform_0, window_bounds = array<i64: 64, 36>}, {pipeline_mode = #tpu.pipeline_mode<synchronous>, transform_indices = @transform_1, window_bounds = array<i64: 36, 128>}, {pipeline_mode = #tpu.pipeline_mode<synchronous>, transform_indices = @transform_2, window_bounds = array<i64: 1, 128>}, {pipeline_mode = #tpu.pipeline_mode<synchronous>, transform_indices = @transform_3, window_bounds = array<i64: 128, 128>}, {pipeline_mode = #tpu.pipeline_mode<synchronous>, transform_indices = @transform_4, window_bounds = array<i64: 1, 128>}, {transform_indices = @transform_5, window_bounds = array<i64: 64, 128>}]} {
    %c0 = arith.constant 0 : index
    %c0_0 = arith.constant 0 : index
    %0 = vector.load %arg1[%c0, %c0_0] : memref<64x36xbf16, #tpu.memory_space<vmem>>, vector<64x36xbf16>
    %c0_1 = arith.constant 0 : index
    %c0_2 = arith.constant 0 : index
    %1 = vector.load %arg2[%c0_1, %c0_2] : memref<36x128xbf16, #tpu.memory_space<vmem>>, vector<36x128xbf16>
    %cst = arith.constant dense<0.000000e+00> : vector<64x128xf32>
    %2 = tpu.matmul %0, %1, %cst {dimension_numbers = #tpu.dot_dimension_numbers<[1], [0], [0], [1], [0, 0, 1, 1], [], []>} : vector<64x36xbf16>, vector<36x128xbf16>, vector<64x128xf32> -> vector<64x128xf32>
    %c0_3 = arith.constant 0 : index
    %c0_4 = arith.constant 0 : index
    %3 = vector.load %arg3[%c0_3, %c0_4] : memref<1x128xf32, #tpu.memory_space<vmem>>, vector<1x128xf32>
    %4 = vector.broadcast %3 : vector<1x128xf32> to vector<64x128xf32>
    %5 = arith.addf %2, %4 : vector<64x128xf32>
    %cst_5 = arith.constant 0.000000e+00 : f32
    %6 = vector.broadcast %cst_5 : f32 to vector<64x128xf32>
    %7 = arith.maximumf %5, %6 : vector<64x128xf32>
    %8 = arith.truncf %7 : vector<64x128xf32> to vector<64x128xbf16>
    %c0_6 = arith.constant 0 : index
    %c0_7 = arith.constant 0 : index
    %9 = vector.load %arg4[%c0_6, %c0_7] : memref<128x128xbf16, #tpu.memory_space<vmem>>, vector<128x128xbf16>
    %cst_8 = arith.constant dense<0.000000e+00> : vector<64x128xf32>
    %10 = tpu.matmul %8, %9, %cst_8 {dimension_numbers = #tpu.dot_dimension_numbers<[1], [0], [0], [1], [0, 0, 1, 1], [], []>} : vector<64x128xbf16>, vector<128x128xbf16>, vector<64x128xf32> -> vector<64x128xf32>
    %c0_9 = arith.constant 0 : index
    %c0_10 = arith.constant 0 : index
    %11 = vector.load %arg5[%c0_9, %c0_10] : memref<1x128xf32, #tpu.memory_space<vmem>>, vector<1x128xf32>
    %12 = vector.broadcast %11 : vector<1x128xf32> to vector<64x128xf32>
    %13 = arith.addf %10, %12 : vector<64x128xf32>
    %c0_11 = arith.constant 0 : index
    %c0_12 = arith.constant 0 : index
    %14 = vector.load %arg6[%c0_11, %c0_12] : memref<64x128xf32, #tpu.memory_space<vmem>>, vector<64x128xf32>
    tpu.vector_store %arg6[%c0_11, %c0_12], %13 {strides = array<i32>} : memref<64x128xf32, #tpu.memory_space<vmem>>, vector<64x128xf32>,
    return
  }
  func.func @transform_0(%arg0: i32) -> (i32, i32) {
    %c0_i32 = arith.constant 0 : i32
    %c0_i32_0 = arith.constant 0 : i32
    return %arg0, %c0_i32 : i32, i32
  }
  func.func @transform_1(%arg0: i32) -> (i32, i32) {
    %c0_i32 = arith.constant 0 : i32
    %c0_i32_0 = arith.constant 0 : i32
    %c0_i32_1 = arith.constant 0 : i32
    return %c0_i32, %c0_i32_0 : i32, i32
  }
  func.func @transform_2(%arg0: i32) -> (i32, i32) {
    %c0_i32 = arith.constant 0 : i32
    %c0_i32_0 = arith.constant 0 : i32
    %c0_i32_1 = arith.constant 0 : i32
    return %c0_i32, %c0_i32_0 : i32, i32
  }
  func.func @transform_3(%arg0: i32) -> (i32, i32) {
    %c0_i32 = arith.constant 0 : i32
    %c0_i32_0 = arith.constant 0 : i32
    %c0_i32_1 = arith.constant 0 : i32
    return %c0_i32, %c0_i32_0 : i32, i32
  }
  func.func @transform_4(%arg0: i32) -> (i32, i32) {
    %c0_i32 = arith.constant 0 : i32
    %c0_i32_0 = arith.constant 0 : i32
    %c0_i32_1 = arith.constant 0 : i32
    return %c0_i32, %c0_i32_0 : i32, i32
  }
  func.func @transform_5(%arg0: i32) -> (i32, i32) {
    %c0_i32 = arith.constant 0 : i32
    %c0_i32_0 = arith.constant 0 : i32
    return %arg0, %c0_i32 : i32, i32
  }
}

</mosaic_0001>

<bundles_post_ra>
// kernel: tpu_custom_call.1
= control target key start
LH: loop header
LB: loop body
LE: loop exit
PB: predicated region body
PF: predicated region fallthrough
CT: control target
= control target key end

     0   :  { %10 = vsyncpa [#allocation3], 0  ;;  %s896_s0 = inlined_call_operand.vmem [shape: bf16[128,36], index: 0, kind: input, shape index: {}]   ;;  %s897_s1 = inlined_call_operand.vmem [shape: bf16[36,128], index: 1, kind: input, shape index: {}]   ;;  %s898_s2 = inlined_call_operand.vmem [shape: f32[1,128], index: 2, kind: input, shape index: {}]   ;;  %s899_s3 = inlined_call_operand.vmem [shape: bf16[128,128], index: 3, kind: input, shape index: {}]   ;;  %s900_s4 = inlined_call_operand.vmem [shape: f32[1,128], index: 4, kind: input, shape index: {}]   ;;  %s901_s5 = inlined_call_operand.hbm [shape: f32[128,128], index: 5, kind: output, shape index: {}]  }
   0x1   :  { %12 = vsyncpa [#allocation3 + $0x1], 0  ;;  %s765_s18 = smov 0   ;;  %s767_s19 = smov 0  }
   0x2   :  { %s769_s20 = smov 0   ;;  %s771_s21 = smov 0  }
   0x3 LB: > { %s786_s22 = sadd.s32 4294967295, %s731_s21   ;;  %s520_s23 = sadd.s32 4294967294, %s731_s21   ;;  %s731_s21 = sphi %s771_s21, %s907_s21   ;;  %s727_s20 = sphi %s769_s20, %s906_s20   ;;  %s723_s19 = sphi %s767_s19, %s905_s19   ;;  %s719_s18 = sphi %s765_s18, %s904_s18  }
   0x4   : > { %s790_s24 = sadd.s32 1, %s731_s21   ;;  %s135_s25 = sadd.s32 1, %s727_s20 }
   0x5   : > { %s132_s26 = ssub.s32 %s731_s21, %s790_s24  ;;  %p145_p0 = scmp.ne.s32.totalorder %s727_s20, %s723_s19 }
   0x6   : > { %p133_p1 = scmp.eq.s32.totalorder %s132_s26, 0  ;;  %p146_p2 = scmp.eq.s32.totalorder %s786_s22, 1 }
   0x7   : > { %p151_p3 = scmp.ne.s32.totalorder %s723_s19, %s719_s18  ;;  %p152_p4 = scmp.eq.s32.totalorder %s520_s23, 1 }
   0x8   : > { %s801_s27 = scalar_select %p133_p1, %s727_s20, %s135_s25  }
   0x9   : > { %p803_p5 = por %p146_p2, %p145_p0  ;;  %p807_p6 = por %p152_p4, %p151_p3 }
   0xa   : > { %p523_p7 = scmp.ge.s32.totalorder %s731_s21, 1  ;;  %p191_p8 = scmp.lt.s32.totalorder %s731_s21, 3 }
   0xc   : > { %p192_p9 = pnand %p523_p7, %p191_p8 }
   0xd   : > { %s525_s7 = sshll.u32 (!%p192_p9), %s786_s22, 3  ;;  %s216_s23 = sand.u32 (!%p192_p9), 1, %s723_s19  }
   0xe   : > { %195 = sbr.rel (%p192_p9) target bundleno = 360 (0x168), region = 40  ;;  %p220_p10 = scmp.lt.s32.totalorder (!%p192_p9), %s525_s7, 15 }
   0xf   : > { %s524_s25 = sshll.u32 (!%p192_p9), %s216_s23, 6  ;;  %s443_s13 = scalar_lea.sflag (!%p192_p9), [#allocation3], %s216_s23 }
  0x10   : > { %s218_s6 = scalar_lea.vmem (!%p192_p9), [#allocation2], %s524_s25  ;;  %s689_s17 = scalar_lea.hbm (!%p192_p9), %s901_s5, 128 }
  0x11   : > { %s455_s11 = sshll.u32 (!%p192_p9), %s218_s6, 4  ;;  %s456_s11 = int_to_ptr.vmem [resolvable:$true] %s455_s11 }
  0x13   : > { %v239_v0 = vld [vmem:[%s897_s1 + $0x10] sm:$0x3]  ;;  %vm292_vm0 = vcmask 1041408   ;;  %s909_s7 = smov (!%p220_p10, %s525_s7), 15  ;;  %v597_v4 = vld [vmem:[%s897_s1 + $0x8] sm:$0xff]  ;;  %v596_v5 = vld [vmem:[%s897_s1] sm:$0xff] }
  0x14   : > { %v273_v1 = vunpack.c.l.b16 %v239_v0  ;;  %s526_s10 = sshll.u32 %s909_s7, 2  ;;  %vm279_vm1 = vcmask 293888   ;;  %v605_v8 = vld [vmem:[%s899_s3 + $0x38] sm:$0xff]  ;;  %v604_v9 = vld [vmem:[%s899_s3 + $0x30] sm:$0xff]  ;;  %v603_v10 = vld [vmem:[%s899_s3 + $0x28] sm:$0xff]  ;;  %s606_s7 = sshll.u32 %s786_s22, 6 }
  0x15   : > { %s223_s15 = scalar_lea.vmem %s896_s0, %s526_s10  ;;  %610 = vmatpush.bf16.msra.mxu1 %v605_v8  ;;  %611 = vmatpush.bf16.msra.mxu2 %v605_v8  ;;  %v602_v11 = vld [vmem:[%s899_s3 + $0x20] sm:$0xff]  ;;  %v601_v14 = vld [vmem:[%s899_s3 + $0x18] sm:$0xff]  ;;  %v600_v15 = vld [vmem:[%s899_s3 + $0x10] sm:$0xff]  ;;  %s454_s10 = scalar_lea.hbm %s901_s5, %s606_s7 }
  0x16   : > { %v276_v2 = vpack.c.b16 %v273_v1, %v273_v1  ;;  %v593_v6 = vld [vmem:[%s223_s15 + $0x8] sm:$0xff]  ;;  %v592_v7 = vld [vmem:[%s223_s15] sm:$0xff]  ;;  %v594_v12 = vld [vmem:[%s223_s15 + $0x10] sm:$0xff]  ;;  %s457_s12 = sshll.u32 %s454_s10, 4  ;;  %s458_s12 = int_to_ptr.hbm [resolvable:$true] %s457_s12 }
  0x17   : > { %v595_v13 = vld [vmem:[%s223_s15 + $0x18] sm:$0xff]  ;;  %v599_v16 = vld [vmem:[%s899_s3 + $0x8] sm:$0xff]  ;;  %v598_v17 = vld [vmem:[%s899_s3] sm:$0xff]  ;;  %s683_s14 = sshra.s32 %s458_s12, 4  ;;  %s684_s14 = int_to_ptr.hbm [resolvable:$true] %s683_s14 }
  0x18   : > { %v294_v3 = vsel %vm292_vm0, %v276_v2, 0  ;;  %v667_v19 = vld [vmem:[%s898_s2] ss:$0 sm:$0xff]  ;;  %s685_s22 = scalar_lea.hbm %s684_s14, 64  ;;  %p690_p0 = scmp.lt.s32.totalorder %s684_s14, %s901_s5 }
  0x19   : > { %607 = vmatpush.bf16.msra.mxu3 %v294_v3  ;;  %301 = vmatpush.bf16.msra.mxu0 %v294_v3  ;;  %v668_v47 = vld [vmem:[%s900_s4] ss:$0 sm:$0xff]  ;;  %p686_p11 = scmp.ne.s32.totalorder %s684_s14, %s685_s22  ;;  %p691_p1 = scmp.lt.s32.totalorder %s689_s17, %s685_s22 }
  0x1a   : > { %612 = vmatpush.bf16.msra.mxu1 %v604_v9  ;;  %613 = vmatpush.bf16.msra.mxu2 %v604_v9 }
  0x1b   : > { %p687_p12 = pnand %p686_p11, %p803_p5  ;;  %p692_p2 = por %p691_p1, %p690_p0 }
  0x1d   : > { %608 = vmatpush.bf16.msra.mxu3 %v597_v4  ;;  %302 = vmatpush.bf16.msra.mxu0 %v597_v4  ;;  %p688_p13 = pneg %p687_p12 }
  0x1e   : > { %614 = vmatpush.bf16.msra.mxu1 %v603_v10  ;;  %615 = vmatpush.bf16.msra.mxu2 %v603_v10 }
  0x1f   : > { %p693_p3 = pnand %p692_p2, %p688_p13 }
  0x21   : > { %609 = vmatpush.bf16.msra.mxu3 %v596_v5  ;;  %303 = vmatpush.bf16.msra.mxu0 %v596_v5 }
  0x22   : > { %616 = vmatpush.bf16.msra.mxu1 %v602_v11  ;;  %617 = vmatpush.bf16.msra.mxu2 %v602_v11 }
  0x24   : > { %552 = vmatmul.msk.bf16.vlgmr.msra.gmra.mxu3 %vm279_vm1, %v593_v6  ;;  %551 = vmatmul.msk.bf16.vlgmr.msra.gmra.mxu0 %vm279_vm1, %v592_v7 }
  0x25   : > { %405 = vmatpush.bf16.msrb.mxu0 %v605_v8 }
  0x26   : > { %618 = vmatpush.bf16.msra.mxu1 %v601_v14  ;;  %619 = vmatpush.bf16.msra.mxu2 %v601_v14 }
  0x29   : > { %406 = vmatpush.bf16.msrb.mxu0 %v604_v9 }
  0x2a   : > { %620 = vmatpush.bf16.msra.mxu1 %v600_v15  ;;  %621 = vmatpush.bf16.msra.mxu2 %v600_v15 }
  0x2d   : > { %407 = vmatpush.bf16.msrb.mxu0 %v603_v10 }
  0x2e   : > { %622 = vmatpush.bf16.msra.mxu1 %v599_v16  ;;  %623 = vmatpush.bf16.msra.mxu2 %v599_v16 }
  0x31   : > { %408 = vmatpush.bf16.msrb.mxu0 %v602_v11 }
  0x32   : > { %624 = vmatpush.bf16.msra.mxu1 %v598_v17  ;;  %625 = vmatpush.bf16.msra.mxu2 %v598_v17 }
  0x34   : > { %553 = vmatmul.msk.bf16.gmra.mxu3 %vm279_vm1, %v594_v12 }
  0x35   : > { %409 = vmatpush.bf16.msrb.mxu0 %v601_v14 }
  0x39   : > { %410 = vmatpush.bf16.msrb.mxu0 %v600_v15 }
  0x3d   : > { %411 = vmatpush.bf16.msrb.mxu0 %v599_v16 }
  0x41   : > { %412 = vmatpush.bf16.msrb.mxu0 %v598_v17 }
  0x44   : > { %554 = vmatmul.msk.bf16.gmra.mxu3 %vm279_vm1, %v595_v13 }
  0xa1   : > { %v305_v18 = vpop.f32.mrf.mxu0 }
  0xa2   : > { %v306_v20 = vadd.f32 %v667_v19, %v305_v18 }
  0xa4   : > { %v325_v23 = vmax.f32 %v306_v20, 0.0 }
  0xa7   : > { %v310_v21 = vpop.f32.mrf.mxu3 }
  0xa8   : > { %v311_v26 = vadd.f32 %v667_v19, %v310_v21 }
  0xa9   : > { %v307_v22 = vpop.f32.mrf.mxu0 }
  0xaa   : > { %v308_v24 = vadd.f32 %v667_v19, %v307_v22  ;;  %v327_v30 = vmax.f32 %v311_v26, 0.0 }
  0xac   : > { %v326_v25 = vmax.f32 %v308_v24, 0.0 }
  0xae   : > { %v333_v27 = vpack.c.bf16 %v326_v25, %v325_v23 }
  0xaf   : > { %v312_v28 = vpop.f32.mrf.mxu3 }
  0xb0   : > { %v313_v29 = vadd.f32 %v667_v19, %v312_v28  ;;  %413 = vmatmul.bf16.vlgmr.msrb.gmra.mxu0 %v333_v27 }
  0xb2   : > { %v328_v31 = vmax.f32 %v313_v29, 0.0 }
  0xb4   : > { %v334_v32 = vpack.c.bf16 %v328_v31, %v327_v30 }
  0xb6   : > { %418 = vmatmul.bf16.vlgmr.msra.gmra.mxu1 %v334_v32 }
  0xb7   : > { %v315_v33 = vpop.f32.mrf.mxu3 }
  0xb8   : > { %v316_v34 = vadd.f32 %v667_v19, %v315_v33 }
  0xba   : > { %v329_v37 = vmax.f32 %v316_v34, 0.0 }
  0xbf   : > { %v317_v35 = vpop.f32.mrf.mxu3 }
  0xc0   : > { %v318_v36 = vadd.f32 %v667_v19, %v317_v35 }
  0xc2   : > { %v330_v38 = vmax.f32 %v318_v36, 0.0 }
  0xc4   : > { %v335_v39 = vpack.c.bf16 %v330_v38, %v329_v37 }
  0xc6   : > { %423 = vmatmul.bf16.vlgmr.msra.gmra.mxu2 %v335_v39 }
  0xc7   : > { %v320_v40 = vpop.f32.mrf.mxu3 }
  0xc8   : > { %v321_v41 = vadd.f32 %v667_v19, %v320_v40 }
  0xca   : > { %v331_v44 = vmax.f32 %v321_v41, 0.0 }
  0xcf   : > { %v322_v42 = vpop.f32.mrf.mxu3 }
  0xd0   : > { %v323_v43 = vadd.f32 %v667_v19, %v322_v42 }
  0xd2   : > { %v332_v45 = vmax.f32 %v323_v43, 0.0 }
  0xd4   : > { %v336_v46 = vpack.c.bf16 %v332_v45, %v331_v44 }
  0xd6   : > { %428 = vmatmul.bf16.gmra.mxu2 %v336_v46 }
 0x12d   : > { %v414_v48 = vpop.f32.mrf.mxu0 }
 0x12e   : > { %v415_v49 = vadd.f32 %v668_v47, %v414_v48 }
 0x130   : > { %434 = vst [vmem:[%s218_s6] sm:$0xff] %v415_v49 }
 0x133   : > { %v419_v50 = vpop.f32.mrf.mxu1 }
 0x134   : > { %v420_v51 = vadd.f32 %v668_v47, %v419_v50 }
 0x135   : > { %v416_v52 = vpop.f32.mrf.mxu0 }
 0x136   : > { %436 = vst [vmem:[%s218_s6 + $0x10] sm:$0xff] %v420_v51  ;;  %v417_v53 = vadd.f32 %v668_v47, %v416_v52 }
 0x138   : > { %435 = vst [vmem:[%s218_s6 + $0x8] sm:$0xff] %v417_v53 }
 0x13b   : > { %v421_v54 = vpop.f32.mrf.mxu1 }
 0x13c   : > { %v422_v55 = vadd.f32 %v668_v47, %v421_v54 }
 0x13e   : > { %437 = vst [vmem:[%s218_s6 + $0x18] sm:$0xff] %v422_v55 }
 0x149   : > { %v424_v56 = vpop.f32.mrf.mxu2 }
 0x14a   : > { %v425_v57 = vadd.f32 %v668_v47, %v424_v56 }
 0x14c   : > { %438 = vst [vmem:[%s218_s6 + $0x20] sm:$0xff] %v425_v57 }
 0x151   : > { %v426_v58 = vpop.f32.mrf.mxu2 }
 0x152   : > { %v427_v59 = vadd.f32 %v668_v47, %v426_v58 }
 0x154   : > { %439 = vst [vmem:[%s218_s6 + $0x28] sm:$0xff] %v427_v59 }
 0x159   : > { %v429_v60 = vpop.f32.mrf.mxu2 }
 0x15a   : > { %v430_v61 = vadd.f32 %v668_v47, %v429_v60 }
 0x15c   : > { %440 = vst [vmem:[%s218_s6 + $0x30] sm:$0xff] %v430_v61 }
 0x161   : > { %v431_v62 = vpop.f32.mrf.mxu2 }
 0x162   : > { %v432_v63 = vadd.f32 %v668_v47, %v431_v62 }
 0x164   : > { %441 = vst [vmem:[%s218_s6 + $0x38] sm:$0xff] %v432_v63 }
 0x165   : > { %696 = shalt.err (!%p693_p3)
}
 0x166   : > { %s733_s23 = smov 128   ;;  %s734_s30 = smov 8  }
 0x167   : > { %626 = dma.vmem_to_hbm [thread:$0]  (%p803_p5), %s456_s11, 1024, %s458_s12, %s443_s13, %s733_s23, %s733_s23, %s734_s30  }
 0x168 PF: > { %p632_p4 = scmp.ge.s32.totalorder %s731_s21, 2  ;;  %s472_s6 = sand.u32 1, %s719_s18  }
 0x169   : > { %s473_s7 = scalar_lea.sflag [#allocation3], %s472_s6 }
 0x16a   : > { %p629_p7 = pnand %p632_p4, %p807_p6 }
 0x16c   : > { %p630_p8 = pneg %p629_p7 }
 0x16e   : > { %714 = dma.done.wait (%p630_p8), %s473_s7, 1024  }
 0x16f   : > { %716 = vsyncadd (%p630_p8), %s473_s7, 4294966272  ;;  %p15_p9 = scmp.ge.s32.totalorder %s790_s24, 4   ;;  %s904_s18 = smov %s723_s19 }
 0x170   : > { %s905_s19 = smov %s727_s20  ;;  %s906_s20 = smov %s801_s27 }
 0x171   : > { %s907_s21 = smov %s790_s24  ;;  %17 = sbr.rel (!%p15_p9) target bundleno = 3 (0x3), region = 75 }
 0x176   :  { %479 = vsyncpa [#allocation3], 1 }
 0x177   :  { %481 = vsyncpa [#allocation3 + $0x1], 1 }

</bundles_post_ra>
